<compile_context>
chip_gen: v5e
topology: v5e:2x2
jax: 0.10.0
libtpu: 0.0.40
codegen_flags: <defaults>
</compile_context>

<pallas_src>
import numpy as np
import jax
import jax.numpy as jnp
from jax.experimental import pallas as pl
from jax.experimental.pallas import tpu as pltpu

# ----------------------------- configuration --------------------------------
BATCH = 2
BASE_IN = 12          # np.sum(input_shape[:-1])
EM_IN = 4             # input_shape[-1]
IN_TOTAL = BASE_IN + EM_IN
HIDDEN = 32           # hidden_shapes = em_hidden_shapes = [32, 32]
MODULE_HIDDEN = 32
MODULE_NUM = 4
GATE_HIDDEN = 32      # gate_hiddens = [32]
GATE_OUT = MODULE_NUM * (MODULE_NUM + 1) // 2   # 10
OUT_SHAPE = 6
OUT_PAD = 8           # last-layer live fan-out, padded to a sublane multiple
CHUNK_OFFS = [0, 1, 3, 6]                       # offsets of chunks of size 1..4

# packed-parameter slab layout: 7 fused layers, 64x64 padded weights
N_LAYERS = 7
PAD_IN = 64
PAD_OUT = 64
L_FRONT0, L_FRONT1, L_GM0, L_GM1, L_MOD2, L_MOD3, L_LAST = range(N_LAYERS)


# ------------------------------- kernel -------------------------------------
def depth_route_kernel(x_ref, w_ref, b_ref, out_ref, cat_ref):
    H = HIDDEN

    def lin(h, idx, n, act=False):
        # bf16 MXU operands, f32 accumulation; bias add / relu in f32 on the
        # live columns only.
        k = h.shape[-1]
        y = jnp.dot(h.astype(jnp.bfloat16), w_ref[idx, :k, :n],
                    preferred_element_type=jnp.float32)
        y = y + b_ref[idx, :, :n]
        return jnp.maximum(y, 0.0) if act else y

    x = x_ref[...]                                  # [tb, 16] = [base_x | em_x]

    # ----- fused base / em_base front end (block-diagonal weights) -----
    # lanes 0:32 carry the base path, lanes 32:64 the em path.
    h0 = lin(x, L_FRONT0, 2 * H, act=True)          # [tb, 64]
    h1 = lin(h0, L_FRONT1, 2 * H)                   # [tb, 64]; null last act
    base_out = h1[:, :H]                            # pre-relu (cond_ob=True)
    em_out = h1[:, H:]

    # assemble [embedding | module_input] through a small VMEM scratch
    cat_ref[:, :H] = em_out * base_out              # embedding (cond_ob)
    cat_ref[:, H:] = jnp.maximum(base_out, 0.0)     # module input

    # ----- fused gate_fc0 + module_fc0 (both relu) -----
    gm0 = lin(cat_ref[...], L_GM0, 2 * H, act=True)  # [g | out0]
    out0 = gm0[:, H:]

    # ----- fused gate_fc_last + module_fc1 -----
    # gm0 is already the concatenated [g | out0] input this layer needs.
    gm1 = lin(gm0, L_GM1, 2 * H)
    gate_logits = gm1[:, :GATE_OUT]                  # cols 0:10 live, no act
    out1 = jnp.maximum(gm1[:, H:], 0.0)              # size-1 gate chunk == 1.0

    # ----- chunk softmaxes (sizes 2..4) -----
    # Subtracting one per-row constant (row max over cols 1:10) is exactly
    # softmax-invariant for every chunk, so a single max + single exp suffice.
    z = gate_logits[:, 1:GATE_OUT]                   # [tb, 9]
    e = jnp.exp(z - jnp.max(z, axis=-1, keepdims=True))
    inv2 = pl.reciprocal(jnp.sum(e[:, 0:2], axis=-1, keepdims=True), approx=True)
    inv3 = pl.reciprocal(jnp.sum(e[:, 2:5], axis=-1, keepdims=True), approx=True)
    inv4 = pl.reciprocal(jnp.sum(e[:, 5:9], axis=-1, keepdims=True), approx=True)
    g2 = e[:, 0:2] * inv2
    g3 = e[:, 2:5] * inv3
    g4 = e[:, 5:9] * inv4

    # ----- remaining module stack (use_resnet=False, resrouting=False) -----
    in2 = g2[:, 0:1] * out0 + g2[:, 1:2] * out1
    out2 = lin(in2, L_MOD2, H, act=True)
    in3 = g3[:, 0:1] * out0 + g3[:, 1:2] * out1 + g3[:, 2:3] * out2
    out3 = lin(in3, L_MOD3, H, act=True)
    last = (g4[:, 0:1] * out0 + g4[:, 1:2] * out1
            + g4[:, 2:3] * out2 + g4[:, 3:4] * out3)

    # final linear (32 -> 6); weight cols 6:8 are zero padding.
    y = lin(last, L_LAST, OUT_PAD)
    out_ref[...] = y[:, :OUT_SHAPE]


# ------------------------------- wrapper -------------------------------------
def _choose_tb(bsz, block_b):
    """Batch tile: multiple of 8, and >=2 grid steps when possible (megacore)."""
    if bsz < 16:
        return bsz                                   # single full-array block
    n_steps = max(2, pl.cdiv(bsz, block_b))          # >=2 iters for v7x 2-TC
    tb = pl.cdiv(bsz, n_steps)
    tb = ((tb + 7) // 8) * 8
    return min(tb, bsz)


def depth_route_net_forward(x, w_slab, b_slab, *, block_b=2048):
    bsz = x.shape[0]
    tb = _choose_tb(bsz, block_b)
    grid = (pl.cdiv(bsz, tb),)
    return pl.pallas_call(
        depth_route_kernel,
        out_shape=jax.ShapeDtypeStruct((bsz, OUT_SHAPE), jnp.float32),
        grid_spec=pltpu.PrefetchScalarGridSpec(
            num_scalar_prefetch=0,
            grid=grid,
            in_specs=[
                pl.BlockSpec((tb, IN_TOTAL), lambda i: (i, 0)),
                # constant index maps: slabs stay resident, DMA'd once
                pl.BlockSpec((N_LAYERS, PAD_IN, PAD_OUT), lambda i: (0, 0, 0)),
                pl.BlockSpec((N_LAYERS, 1, PAD_OUT), lambda i: (0, 0, 0)),
            ],
            out_specs=pl.BlockSpec((tb, OUT_SHAPE), lambda i: (i, 0)),
            scratch_shapes=[pltpu.VMEM((tb, 2 * HIDDEN), jnp.float32)],
        ),
        compiler_params=pltpu.CompilerParams(
            dimension_semantics=("parallel",)),
    )(x, w_slab, b_slab)


# --------------------------- parameter packing --------------------------------
def pack_params(params):
    """Pack the 22 small tensors into a bf16 weight slab and an f32 bias slab."""
    W = np.zeros((N_LAYERS, PAD_IN, PAD_OUT), np.float32)
    B = np.zeros((N_LAYERS, 1, PAD_OUT), np.float32)

    def put(idx, w, b, row0=0, col0=0):
        w = np.asarray(w, np.float32)
        b = np.asarray(b, np.float32).reshape(-1)
        W[idx, row0:row0 + w.shape[0], col0:col0 + w.shape[1]] = w
        B[idx, 0, col0:col0 + b.shape[0]] = b

    # fused front-end layer 0 (block diagonal): base 12->32, em 4->32
    put(L_FRONT0, params["wb0"], params["bb0"], row0=0, col0=0)
    put(L_FRONT0, params["we0"], params["be0"], row0=BASE_IN, col0=HIDDEN)
    # fused front-end layer 1: base 32->32, em 32->32
    put(L_FRONT1, params["wb1"], params["bb1"], row0=0, col0=0)
    put(L_FRONT1, params["we1"], params["be1"], row0=HIDDEN, col0=HIDDEN)
    # fused gate_fc0 (32->32, input = embedding) + module_fc0 (32->32)
    put(L_GM0, params["wg0"], params["bg0"], row0=0, col0=0)
    put(L_GM0, params["wm0"], params["bm0"], row0=HIDDEN, col0=HIDDEN)
    # fused gate_fc_last (32->10, input = g) + module_fc1 (32->32, input = out0)
    put(L_GM1, params["wg1"], params["bg1"], row0=0, col0=0)
    put(L_GM1, params["wm1"], params["bm1"], row0=HIDDEN, col0=HIDDEN)
    # remaining module fcs
    put(L_MOD2, params["wm2"], params["bm2"], row0=0, col0=0)
    put(L_MOD3, params["wm3"], params["bm3"], row0=0, col0=0)
    # last linear (32 -> 6), zero-padded to 8 output lanes
    put(L_LAST, params["wl"], params["bl"], row0=0, col0=0)
    return jnp.asarray(W, jnp.bfloat16), jnp.asarray(B, jnp.float32)


# ----------------------- pure-JAX reference (for checking) -------------------
def reference_forward(x, params):
    relu = lambda v: jnp.maximum(v, 0.0)
    lin = lambda a, w, b: a @ w + b

    base_x, em_x = x[:, :BASE_IN], x[:, BASE_IN:]
    base_out = lin(relu(lin(base_x, params["wb0"], params["bb0"])),
                   params["wb1"], params["bb1"])
    em_out = lin(relu(lin(em_x, params["we0"], params["be0"])),
                 params["we1"], params["be1"])
    embedding = em_out * base_out
    module_input = relu(base_out)

    gate_logits = lin(relu(lin(embedding, params["wg0"], params["bg0"])),
                      params["wg1"], params["bg1"])
    gates = [jax.nn.softmax(
                 gate_logits[:, CHUNK_OFFS[m - 1]:CHUNK_OFFS[m - 1] + m],
                 axis=-1)
             for m in range(1, MODULE_NUM + 1)]

    outs = [relu(lin(module_input, params["wm0"], params["bm0"]))]
    mws = [("wm1", "bm1"), ("wm2", "bm2"), ("wm3", "bm3")]
    for i, (wk, bk) in enumerate(mws):
        gate = gates[i]
        fc_in = sum(gate[:, j:j + 1] * outs[j] for j in range(i + 1))
        outs.append(relu(lin(fc_in, params[wk], params[bk])))

    last_gate = gates[-1]
    last_out = sum(last_gate[:, j:j + 1] * outs[j] for j in range(MODULE_NUM))
    return lin(last_out, params["wl"], params["bl"])


# ------------------------------ param init -----------------------------------
def init_params(key):
    shapes = {
        "wb0": (BASE_IN, HIDDEN), "bb0": (1, HIDDEN),
        "wb1": (HIDDEN, HIDDEN), "bb1": (1, HIDDEN),
        "we0": (EM_IN, HIDDEN), "be0": (1, HIDDEN),
        "we1": (HIDDEN, HIDDEN), "be1": (1, HIDDEN),
        "wg0": (HIDDEN, GATE_HIDDEN), "bg0": (1, GATE_HIDDEN),
        "wg1": (GATE_HIDDEN, GATE_OUT), "bg1": (1, GATE_OUT),
        "wm0": (HIDDEN, MODULE_HIDDEN), "bm0": (1, MODULE_HIDDEN),
        "wm1": (MODULE_HIDDEN, MODULE_HIDDEN), "bm1": (1, MODULE_HIDDEN),
        "wm2": (MODULE_HIDDEN, MODULE_HIDDEN), "bm2": (1, MODULE_HIDDEN),
        "wm3": (MODULE_HIDDEN, MODULE_HIDDEN), "bm3": (1, MODULE_HIDDEN),
        "wl": (MODULE_HIDDEN, OUT_SHAPE), "bl": (1, OUT_SHAPE),
    }
    params = {}
    keys = jax.random.split(key, len(shapes))
    for k, (name, shp) in zip(keys, sorted(shapes.items())):
        if name.startswith("w"):
            params[name] = jax.random.normal(k, shp, jnp.float32) * 0.1
        else:
            params[name] = jax.random.normal(k, shp, jnp.float32) * 0.01
    return params


# --------------------------------- main ---------------------------------------
if __name__ == "__main__":
    key = jax.random.PRNGKey(0)
    kx, kp = jax.random.split(key)
    x = jax.random.normal(kx, (BATCH, IN_TOTAL), jnp.float32)
    params = init_params(kp)

    w_slab, b_slab = pack_params(params)

    out = depth_route_net_forward(x, w_slab, b_slab)
    out = jax.block_until_ready(out)

    ref = reference_forward(x, params)
    assert out.shape == (BATCH, OUT_SHAPE)
    # looser tolerance: bf16 matmul operands + approx reciprocal in the kernel
    assert jnp.allclose(out, ref, rtol=5e-2, atol=5e-3), (out, ref)

    print("KERNEL_OK")
</pallas_src>

<mosaic_0001>
module attributes {stable_mosaic.version = 11 : i64} {
  func.func @depth_route_kernel(%arg0: i32, %arg1: memref<2x16xf32, #tpu.memory_space<vmem>>, %arg2: memref<7x64x64xbf16, #tpu.memory_space<vmem>>, %arg3: memref<7x1x64xf32, #tpu.memory_space<vmem>>, %arg4: memref<2x6xf32, #tpu.memory_space<vmem>>, %arg5: memref<2x64xf32, #tpu.memory_space<vmem>>) attributes {dimension_semantics = [#tpu.dimension_semantics<parallel>], iteration_bounds = array<i64: 1>, scalar_prefetch = 0 : i64, scratch_operands = 1 : i64, tpu.core_type = #tpu.core_type<tc>, window_params = [{transform_indices = @transform_0, window_bounds = array<i64: 2, 16>}, {pipeline_mode = #tpu.pipeline_mode<synchronous>, transform_indices = @transform_1, window_bounds = array<i64: 7, 64, 64>}, {pipeline_mode = #tpu.pipeline_mode<synchronous>, transform_indices = @transform_2, window_bounds = array<i64: 7, 1, 64>}, {transform_indices = @transform_3, window_bounds = array<i64: 2, 6>}]} {
    %c0 = arith.constant 0 : index
    %c0_0 = arith.constant 0 : index
    %0 = vector.load %arg1[%c0, %c0_0] : memref<2x16xf32, #tpu.memory_space<vmem>>, vector<2x16xf32>
    %1 = arith.truncf %0 : vector<2x16xf32> to vector<2x16xbf16>
    %c0_1 = arith.constant 0 : index
    %c0_2 = arith.constant 0 : index
    %c0_3 = arith.constant 0 : index
    %2 = vector.load %arg2[%c0_1, %c0_2, %c0_3] : memref<7x64x64xbf16, #tpu.memory_space<vmem>>, vector<1x16x64xbf16>
    %3 = vector.shape_cast %2 : vector<1x16x64xbf16> to vector<16x64xbf16>
    %cst = arith.constant dense<0.000000e+00> : vector<2x64xf32>
    %4 = tpu.matmul %1, %3, %cst {dimension_numbers = #tpu.dot_dimension_numbers<[1], [0], [0], [1], [0, 0, 1, 1], [], []>} : vector<2x16xbf16>, vector<16x64xbf16>, vector<2x64xf32> -> vector<2x64xf32>
    %c0_4 = arith.constant 0 : index
    %c0_5 = arith.constant 0 : index
    %c0_6 = arith.constant 0 : index
    %5 = vector.load %arg3[%c0_4, %c0_5, %c0_6] : memref<7x1x64xf32, #tpu.memory_space<vmem>>, vector<1x1x64xf32>
    %6 = vector.shape_cast %5 : vector<1x1x64xf32> to vector<1x64xf32>
    %7 = vector.broadcast %6 : vector<1x64xf32> to vector<2x64xf32>
    %8 = arith.addf %4, %7 : vector<2x64xf32>
    %cst_7 = arith.constant 0.000000e+00 : f32
    %9 = vector.broadcast %cst_7 : f32 to vector<2x64xf32>
    %10 = arith.maximumf %8, %9 : vector<2x64xf32>
    %11 = arith.truncf %10 : vector<2x64xf32> to vector<2x64xbf16>
    %c1 = arith.constant 1 : index
    %c0_8 = arith.constant 0 : index
    %c0_9 = arith.constant 0 : index
    %12 = vector.load %arg2[%c1, %c0_8, %c0_9] : memref<7x64x64xbf16, #tpu.memory_space<vmem>>, vector<1x64x64xbf16>
    %13 = vector.shape_cast %12 : vector<1x64x64xbf16> to vector<64x64xbf16>
    %cst_10 = arith.constant dense<0.000000e+00> : vector<2x64xf32>
    %14 = tpu.matmul %11, %13, %cst_10 {dimension_numbers = #tpu.dot_dimension_numbers<[1], [0], [0], [1], [0, 0, 1, 1], [], []>} : vector<2x64xbf16>, vector<64x64xbf16>, vector<2x64xf32> -> vector<2x64xf32>
    %c1_11 = arith.constant 1 : index
    %c0_12 = arith.constant 0 : index
    %c0_13 = arith.constant 0 : index
    %15 = vector.load %arg3[%c1_11, %c0_12, %c0_13] : memref<7x1x64xf32, #tpu.memory_space<vmem>>, vector<1x1x64xf32>
    %16 = vector.shape_cast %15 : vector<1x1x64xf32> to vector<1x64xf32>
    %17 = vector.broadcast %16 : vector<1x64xf32> to vector<2x64xf32>
    %18 = arith.addf %14, %17 : vector<2x64xf32>
    %19 = vector.extract_strided_slice %18 {offsets = [0, 0], sizes = [2, 32], strides = [1, 1]} : vector<2x64xf32> to vector<2x32xf32>
    %20 = vector.extract_strided_slice %18 {offsets = [0, 32], sizes = [2, 32], strides = [1, 1]} : vector<2x64xf32> to vector<2x32xf32>
    %21 = arith.mulf %20, %19 : vector<2x32xf32>
    %c0_14 = arith.constant 0 : index
    %c0_15 = arith.constant 0 : index
    %22 = vector.load %arg5[%c0_14, %c0_15] : memref<2x64xf32, #tpu.memory_space<vmem>>, vector<2x32xf32>
    tpu.vector_store %arg5[%c0_14, %c0_15], %21 {strides = array<i32>} : memref<2x64xf32, #tpu.memory_space<vmem>>, vector<2x32xf32>,
    %cst_16 = arith.constant 0.000000e+00 : f32
    %23 = vector.broadcast %cst_16 : f32 to vector<2x32xf32>
    %24 = arith.maximumf %19, %23 : vector<2x32xf32>
    %c0_17 = arith.constant 0 : index
    %c32 = arith.constant 32 : index
    %25 = vector.load %arg5[%c0_17, %c32] : memref<2x64xf32, #tpu.memory_space<vmem>>, vector<2x32xf32>
    tpu.vector_store %arg5[%c0_17, %c32], %24 {strides = array<i32>} : memref<2x64xf32, #tpu.memory_space<vmem>>, vector<2x32xf32>,
    %c0_18 = arith.constant 0 : index
    %c0_19 = arith.constant 0 : index
    %26 = vector.load %arg5[%c0_18, %c0_19] : memref<2x64xf32, #tpu.memory_space<vmem>>, vector<2x64xf32>
    %27 = arith.truncf %26 : vector<2x64xf32> to vector<2x64xbf16>
    %c2 = arith.constant 2 : index
    %c0_20 = arith.constant 0 : index
    %c0_21 = arith.constant 0 : index
    %28 = vector.load %arg2[%c2, %c0_20, %c0_21] : memref<7x64x64xbf16, #tpu.memory_space<vmem>>, vector<1x64x64xbf16>
    %29 = vector.shape_cast %28 : vector<1x64x64xbf16> to vector<64x64xbf16>
    %cst_22 = arith.constant dense<0.000000e+00> : vector<2x64xf32>
    %30 = tpu.matmul %27, %29, %cst_22 {dimension_numbers = #tpu.dot_dimension_numbers<[1], [0], [0], [1], [0, 0, 1, 1], [], []>} : vector<2x64xbf16>, vector<64x64xbf16>, vector<2x64xf32> -> vector<2x64xf32>
    %c2_23 = arith.constant 2 : index
    %c0_24 = arith.constant 0 : index
    %c0_25 = arith.constant 0 : index
    %31 = vector.load %arg3[%c2_23, %c0_24, %c0_25] : memref<7x1x64xf32, #tpu.memory_space<vmem>>, vector<1x1x64xf32>
    %32 = vector.shape_cast %31 : vector<1x1x64xf32> to vector<1x64xf32>
    %33 = vector.broadcast %32 : vector<1x64xf32> to vector<2x64xf32>
    %34 = arith.addf %30, %33 : vector<2x64xf32>
    %cst_26 = arith.constant 0.000000e+00 : f32
    %35 = vector.broadcast %cst_26 : f32 to vector<2x64xf32>
    %36 = arith.maximumf %34, %35 : vector<2x64xf32>
    %37 = vector.extract_strided_slice %36 {offsets = [0, 32], sizes = [2, 32], strides = [1, 1]} : vector<2x64xf32> to vector<2x32xf32>
    %38 = arith.truncf %36 : vector<2x64xf32> to vector<2x64xbf16>
    %c3 = arith.constant 3 : index
    %c0_27 = arith.constant 0 : index
    %c0_28 = arith.constant 0 : index
    %39 = vector.load %arg2[%c3, %c0_27, %c0_28] : memref<7x64x64xbf16, #tpu.memory_space<vmem>>, vector<1x64x64xbf16>
    %40 = vector.shape_cast %39 : vector<1x64x64xbf16> to vector<64x64xbf16>
    %cst_29 = arith.constant dense<0.000000e+00> : vector<2x64xf32>
    %41 = tpu.matmul %38, %40, %cst_29 {dimension_numbers = #tpu.dot_dimension_numbers<[1], [0], [0], [1], [0, 0, 1, 1], [], []>} : vector<2x64xbf16>, vector<64x64xbf16>, vector<2x64xf32> -> vector<2x64xf32>
    %c3_30 = arith.constant 3 : index
    %c0_31 = arith.constant 0 : index
    %c0_32 = arith.constant 0 : index
    %42 = vector.load %arg3[%c3_30, %c0_31, %c0_32] : memref<7x1x64xf32, #tpu.memory_space<vmem>>, vector<1x1x64xf32>
    %43 = vector.shape_cast %42 : vector<1x1x64xf32> to vector<1x64xf32>
    %44 = vector.broadcast %43 : vector<1x64xf32> to vector<2x64xf32>
    %45 = arith.addf %41, %44 : vector<2x64xf32>
    %46 = vector.extract_strided_slice %45 {offsets = [0, 0], sizes = [2, 10], strides = [1, 1]} : vector<2x64xf32> to vector<2x10xf32>
    %47 = vector.extract_strided_slice %45 {offsets = [0, 32], sizes = [2, 32], strides = [1, 1]} : vector<2x64xf32> to vector<2x32xf32>
    %cst_33 = arith.constant 0.000000e+00 : f32
    %48 = vector.broadcast %cst_33 : f32 to vector<2x32xf32>
    %49 = arith.maximumf %47, %48 : vector<2x32xf32>
    %50 = vector.extract_strided_slice %46 {offsets = [0, 1], sizes = [2, 9], strides = [1, 1]} : vector<2x10xf32> to vector<2x9xf32>
    %cst_34 = arith.constant dense<0xFF800000> : vector<2xf32>
    %51 = vector.multi_reduction <maximumf>, %50, %cst_34 [1] : vector<2x9xf32> to vector<2xf32>
    %52 = vector.shape_cast %51 : vector<2xf32> to vector<2x1xf32>
    %53 = vector.broadcast %52 : vector<2x1xf32> to vector<2x9xf32>
    %54 = arith.subf %50, %53 : vector<2x9xf32>
    %55 = math.exp %54 : vector<2x9xf32>
    %56 = vector.extract_strided_slice %55 {offsets = [0, 0], sizes = [2, 2], strides = [1, 1]} : vector<2x9xf32> to vector<2x2xf32>
    %cst_35 = arith.constant dense<0.000000e+00> : vector<2xf32>
    %57 = vector.multi_reduction <add>, %56, %cst_35 [1] : vector<2x2xf32> to vector<2xf32>
    %58 = vector.shape_cast %57 : vector<2xf32> to vector<2x1xf32>
    %59 = tpu.reciprocal %58 {approx = true} : vector<2x1xf32> -> vector<2x1xf32>
    %60 = vector.extract_strided_slice %55 {offsets = [0, 2], sizes = [2, 3], strides = [1, 1]} : vector<2x9xf32> to vector<2x3xf32>
    %cst_36 = arith.constant dense<0.000000e+00> : vector<2xf32>
    %61 = vector.multi_reduction <add>, %60, %cst_36 [1] : vector<2x3xf32> to vector<2xf32>
    %62 = vector.shape_cast %61 : vector<2xf32> to vector<2x1xf32>
    %63 = tpu.reciprocal %62 {approx = true} : vector<2x1xf32> -> vector<2x1xf32>
    %64 = vector.extract_strided_slice %55 {offsets = [0, 5], sizes = [2, 4], strides = [1, 1]} : vector<2x9xf32> to vector<2x4xf32>
    %cst_37 = arith.constant dense<0.000000e+00> : vector<2xf32>
    %65 = vector.multi_reduction <add>, %64, %cst_37 [1] : vector<2x4xf32> to vector<2xf32>
    %66 = vector.shape_cast %65 : vector<2xf32> to vector<2x1xf32>
    %67 = tpu.reciprocal %66 {approx = true} : vector<2x1xf32> -> vector<2x1xf32>
    %68 = vector.extract_strided_slice %55 {offsets = [0, 0], sizes = [2, 2], strides = [1, 1]} : vector<2x9xf32> to vector<2x2xf32>
    %69 = vector.broadcast %59 : vector<2x1xf32> to vector<2x2xf32>
    %70 = arith.mulf %68, %69 : vector<2x2xf32>
    %71 = vector.extract_strided_slice %55 {offsets = [0, 2], sizes = [2, 3], strides = [1, 1]} : vector<2x9xf32> to vector<2x3xf32>
    %72 = vector.broadcast %63 : vector<2x1xf32> to vector<2x3xf32>
    %73 = arith.mulf %71, %72 : vector<2x3xf32>
    %74 = vector.extract_strided_slice %55 {offsets = [0, 5], sizes = [2, 4], strides = [1, 1]} : vector<2x9xf32> to vector<2x4xf32>
    %75 = vector.broadcast %67 : vector<2x1xf32> to vector<2x4xf32>
    %76 = arith.mulf %74, %75 : vector<2x4xf32>
    %77 = vector.extract_strided_slice %70 {offsets = [0, 0], sizes = [2, 1], strides = [1, 1]} : vector<2x2xf32> to vector<2x1xf32>
    %78 = vector.broadcast %77 : vector<2x1xf32> to vector<2x32xf32>
    %79 = arith.mulf %78, %37 : vector<2x32xf32>
    %80 = vector.extract_strided_slice %70 {offsets = [0, 1], sizes = [2, 1], strides = [1, 1]} : vector<2x2xf32> to vector<2x1xf32>
    %81 = vector.broadcast %80 : vector<2x1xf32> to vector<2x32xf32>
    %82 = arith.mulf %81, %49 : vector<2x32xf32>
    %83 = arith.addf %79, %82 : vector<2x32xf32>
    %84 = arith.truncf %83 : vector<2x32xf32> to vector<2x32xbf16>
    %c4 = arith.constant 4 : index
    %c0_38 = arith.constant 0 : index
    %c0_39 = arith.constant 0 : index
    %85 = vector.load %arg2[%c4, %c0_38, %c0_39] : memref<7x64x64xbf16, #tpu.memory_space<vmem>>, vector<1x32x32xbf16>
    %86 = vector.shape_cast %85 : vector<1x32x32xbf16> to vector<32x32xbf16>
    %cst_40 = arith.constant dense<0.000000e+00> : vector<2x32xf32>
    %87 = tpu.matmul %84, %86, %cst_40 {dimension_numbers = #tpu.dot_dimension_numbers<[1], [0], [0], [1], [0, 0, 1, 1], [], []>} : vector<2x32xbf16>, vector<32x32xbf16>, vector<2x32xf32> -> vector<2x32xf32>
    %c4_41 = arith.constant 4 : index
    %c0_42 = arith.constant 0 : index
    %c0_43 = arith.constant 0 : index
    %88 = vector.load %arg3[%c4_41, %c0_42, %c0_43] : memref<7x1x64xf32, #tpu.memory_space<vmem>>, vector<1x1x32xf32>
    %89 = vector.shape_cast %88 : vector<1x1x32xf32> to vector<1x32xf32>
    %90 = vector.broadcast %89 : vector<1x32xf32> to vector<2x32xf32>
    %91 = arith.addf %87, %90 : vector<2x32xf32>
    %cst_44 = arith.constant 0.000000e+00 : f32
    %92 = vector.broadcast %cst_44 : f32 to vector<2x32xf32>
    %93 = arith.maximumf %91, %92 : vector<2x32xf32>
    %94 = vector.extract_strided_slice %73 {offsets = [0, 0], sizes = [2, 1], strides = [1, 1]} : vector<2x3xf32> to vector<2x1xf32>
    %95 = vector.broadcast %94 : vector<2x1xf32> to vector<2x32xf32>
    %96 = arith.mulf %95, %37 : vector<2x32xf32>
    %97 = vector.extract_strided_slice %73 {offsets = [0, 1], sizes = [2, 1], strides = [1, 1]} : vector<2x3xf32> to vector<2x1xf32>
    %98 = vector.broadcast %97 : vector<2x1xf32> to vector<2x32xf32>
    %99 = arith.mulf %98, %49 : vector<2x32xf32>
    %100 = arith.addf %96, %99 : vector<2x32xf32>
    %101 = vector.extract_strided_slice %73 {offsets = [0, 2], sizes = [2, 1], strides = [1, 1]} : vector<2x3xf32> to vector<2x1xf32>
    %102 = vector.broadcast %101 : vector<2x1xf32> to vector<2x32xf32>
    %103 = arith.mulf %102, %93 : vector<2x32xf32>
    %104 = arith.addf %100, %103 : vector<2x32xf32>
    %105 = arith.truncf %104 : vector<2x32xf32> to vector<2x32xbf16>
    %c5 = arith.constant 5 : index
    %c0_45 = arith.constant 0 : index
    %c0_46 = arith.constant 0 : index
    %106 = vector.load %arg2[%c5, %c0_45, %c0_46] : memref<7x64x64xbf16, #tpu.memory_space<vmem>>, vector<1x32x32xbf16>
    %107 = vector.shape_cast %106 : vector<1x32x32xbf16> to vector<32x32xbf16>
    %cst_47 = arith.constant dense<0.000000e+00> : vector<2x32xf32>
    %108 = tpu.matmul %105, %107, %cst_47 {dimension_numbers = #tpu.dot_dimension_numbers<[1], [0], [0], [1], [0, 0, 1, 1], [], []>} : vector<2x32xbf16>, vector<32x32xbf16>, vector<2x32xf32> -> vector<2x32xf32>
    %c5_48 = arith.constant 5 : index
    %c0_49 = arith.constant 0 : index
    %c0_50 = arith.constant 0 : index
    %109 = vector.load %arg3[%c5_48, %c0_49, %c0_50] : memref<7x1x64xf32, #tpu.memory_space<vmem>>, vector<1x1x32xf32>
    %110 = vector.shape_cast %109 : vector<1x1x32xf32> to vector<1x32xf32>
    %111 = vector.broadcast %110 : vector<1x32xf32> to vector<2x32xf32>
    %112 = arith.addf %108, %111 : vector<2x32xf32>
    %cst_51 = arith.constant 0.000000e+00 : f32
    %113 = vector.broadcast %cst_51 : f32 to vector<2x32xf32>
    %114 = arith.maximumf %112, %113 : vector<2x32xf32>
    %115 = vector.extract_strided_slice %76 {offsets = [0, 0], sizes = [2, 1], strides = [1, 1]} : vector<2x4xf32> to vector<2x1xf32>
    %116 = vector.broadcast %115 : vector<2x1xf32> to vector<2x32xf32>
    %117 = arith.mulf %116, %37 : vector<2x32xf32>
    %118 = vector.extract_strided_slice %76 {offsets = [0, 1], sizes = [2, 1], strides = [1, 1]} : vector<2x4xf32> to vector<2x1xf32>
    %119 = vector.broadcast %118 : vector<2x1xf32> to vector<2x32xf32>
    %120 = arith.mulf %119, %49 : vector<2x32xf32>
    %121 = arith.addf %117, %120 : vector<2x32xf32>
    %122 = vector.extract_strided_slice %76 {offsets = [0, 2], sizes = [2, 1], strides = [1, 1]} : vector<2x4xf32> to vector<2x1xf32>
    %123 = vector.broadcast %122 : vector<2x1xf32> to vector<2x32xf32>
    %124 = arith.mulf %123, %93 : vector<2x32xf32>
    %125 = arith.addf %121, %124 : vector<2x32xf32>
    %126 = vector.extract_strided_slice %76 {offsets = [0, 3], sizes = [2, 1], strides = [1, 1]} : vector<2x4xf32> to vector<2x1xf32>
    %127 = vector.broadcast %126 : vector<2x1xf32> to vector<2x32xf32>
    %128 = arith.mulf %127, %114 : vector<2x32xf32>
    %129 = arith.addf %125, %128 : vector<2x32xf32>
    %130 = arith.truncf %129 : vector<2x32xf32> to vector<2x32xbf16>
    %c6 = arith.constant 6 : index
    %c0_52 = arith.constant 0 : index
    %c0_53 = arith.constant 0 : index
    %131 = vector.load %arg2[%c6, %c0_52, %c0_53] : memref<7x64x64xbf16, #tpu.memory_space<vmem>>, vector<1x32x8xbf16>
    %132 = vector.shape_cast %131 : vector<1x32x8xbf16> to vector<32x8xbf16>
    %cst_54 = arith.constant dense<0.000000e+00> : vector<2x8xf32>
    %133 = tpu.matmul %130, %132, %cst_54 {dimension_numbers = #tpu.dot_dimension_numbers<[1], [0], [0], [1], [0, 0, 1, 1], [], []>} : vector<2x32xbf16>, vector<32x8xbf16>, vector<2x8xf32> -> vector<2x8xf32>
    %c6_55 = arith.constant 6 : index
    %c0_56 = arith.constant 0 : index
    %c0_57 = arith.constant 0 : index
    %134 = vector.load %arg3[%c6_55, %c0_56, %c0_57] : memref<7x1x64xf32, #tpu.memory_space<vmem>>, vector<1x1x8xf32>
    %135 = vector.shape_cast %134 : vector<1x1x8xf32> to vector<1x8xf32>
    %136 = vector.broadcast %135 : vector<1x8xf32> to vector<2x8xf32>
    %137 = arith.addf %133, %136 : vector<2x8xf32>
    %138 = vector.extract_strided_slice %137 {offsets = [0, 0], sizes = [2, 6], strides = [1, 1]} : vector<2x8xf32> to vector<2x6xf32>
    %c0_58 = arith.constant 0 : index
    %c0_59 = arith.constant 0 : index
    %139 = vector.load %arg4[%c0_58, %c0_59] : memref<2x6xf32, #tpu.memory_space<vmem>>, vector<2x6xf32>
    tpu.vector_store %arg4[%c0_58, %c0_59], %138 {strides = array<i32>} : memref<2x6xf32, #tpu.memory_space<vmem>>, vector<2x6xf32>,
    return
  }
  func.func @transform_0(%arg0: i32) -> (i32, i32) {
    %c0_i32 = arith.constant 0 : i32
    %c0_i32_0 = arith.constant 0 : i32
    return %arg0, %c0_i32 : i32, i32
  }
  func.func @transform_1(%arg0: i32) -> (i32, i32, i32) {
    %c0_i32 = arith.constant 0 : i32
    %c0_i32_0 = arith.constant 0 : i32
    %c0_i32_1 = arith.constant 0 : i32
    %c0_i32_2 = arith.constant 0 : i32
    return %c0_i32, %c0_i32_0, %c0_i32_1 : i32, i32, i32
  }
  func.func @transform_2(%arg0: i32) -> (i32, i32, i32) {
    %c0_i32 = arith.constant 0 : i32
    %c0_i32_0 = arith.constant 0 : i32
    %c0_i32_1 = arith.constant 0 : i32
    %c0_i32_2 = arith.constant 0 : i32
    return %c0_i32, %c0_i32_0, %c0_i32_1 : i32, i32, i32
  }
  func.func @transform_3(%arg0: i32) -> (i32, i32) {
    %c0_i32 = arith.constant 0 : i32
    %c0_i32_0 = arith.constant 0 : i32
    return %arg0, %c0_i32 : i32, i32
  }
}

</mosaic_0001>

<bundles_post_ra>
// kernel: tpu_custom_call.1
= control target key start
LH: loop header
LB: loop body
LE: loop exit
PB: predicated region body
PF: predicated region fallthrough
CT: control target
= control target key end

     0   :  { %8 = vsyncpa [#allocation4], 0  ;;  %s870_s0 = inlined_call_operand.hbm [shape: f32[2,16], index: 0, kind: input, shape index: {}]   ;;  %s871_s1 = inlined_call_operand.hbm [shape: bf16[7,64,64], index: 1, kind: input, shape index: {}]   ;;  %s872_s2 = inlined_call_operand.hbm [shape: f32[7,1,64], index: 2, kind: input, shape index: {}]   ;;  %s873_s3 = inlined_call_operand.hbm [shape: f32[2,6], index: 3, kind: output, shape index: {}]  }
   0x1   :  { %9 = vsyncpa [#allocation7], 0  ;;  %s26_s14 = sshll.u32 %s871_s1, 4  ;;  %s27_s14 = int_to_ptr.hbm [resolvable:$true] %s26_s14 }
   0x2   :  { %10 = vsyncpa [#allocation5], 0  ;;  %s781_s15 = smov [#allocation6]   ;;  %s16_s19 = sshll.u32 %s870_s0, 4  ;;  %s17_s19 = int_to_ptr.hbm [resolvable:$true] %s16_s19 }
   0x3   :  { %s28_s16 = sshll.u32 %s781_s15, 4  ;;  %s782_s20 = smov 64   ;;  %s29_s16 = int_to_ptr.vmem [resolvable:$true] %s28_s16 }
   0x4   :  { %s783_s21 = smov 4   ;;  %s784_s22 = smov [#allocation3]  }
   0x5   :  { %34 = dma.hbm_to_vmem [thread:$0]  %s27_s14, 3584, %s29_s16, [#allocation7], %s782_s20, %s782_s20, %s783_s21  }
   0x6   :  { %s18_s23 = sshll.u32 %s784_s22, 4  ;;  %s39_s26 = sshll.u32 %s872_s2, 4  ;;  %s19_s23 = int_to_ptr.vmem [resolvable:$true] %s18_s23  ;;  %s40_s26 = int_to_ptr.hbm [resolvable:$true] %s39_s26 }
   0x7   :  { %21 = dma.hbm_to_vmem [thread:$0]  %s17_s19, 32, %s19_s23, [#allocation4]  }
   0x8   :  { %s785_s1 = smov [#allocation8]   ;;  %s786_s28 = smov 16  }
   0x9   :  { %s41_s27 = sshll.u32 %s785_s1, 4  ;;  %s787_s29 = smov 1   ;;  %s42_s27 = int_to_ptr.vmem [resolvable:$true] %s41_s27 }
   0xa   :  { %47 = dma.hbm_to_vmem [thread:$0]  %s40_s26, 112, %s42_s27, [#allocation7], %s786_s28, %s786_s28, %s787_s29  }
   0xb   :  { %775 = dma.done.wait [#allocation4], 32  }
   0xc   :  { %776 = vsyncadd [#allocation4], 4294967264 }
   0xd   :  { %777 = dma.done.wait [#allocation7], 3696  }
   0xe   :  { %778 = vsyncadd [#allocation7], 4294963600  ;;  %v613_v0 = vld [vmem:[#allocation6] sm:$0xff]  ;;  %v61_v1 = vld [vmem:[#allocation3] sm:$0x3]  ;;  %vm75_vm0 = vcmask 130048  }
   0xf   :  { %v617_v2 = vld [vmem:[#allocation6 + $0x38] sm:$0xff]  ;;  %v62_v3 = vpack.c.bf16 %v61_v1, %v61_v1  ;;  %v616_v4 = vld [vmem:[#allocation6 + $0x30] sm:$0xff]  ;;  %86 = vmatpush.bf16.msra.mxu0 %v613_v0  ;;  %v615_v5 = vld [vmem:[#allocation6 + $0x28] sm:$0xff]  ;;  %vm132_vm1 = vcmask 523264   ;;  %s788_s0 = smov 32   ;;  %s789_s2 = smov 96  }
  0x10   :  { %140 = vmatpush.bf16.msra.mxu1 %v617_v2  ;;  %v614_v6 = vld [vmem:[#allocation6 + $0x20] sm:$0xff]  ;;  %v621_v18 = vld [vmem:[#allocation6 + $0x58] sm:$0xff]  ;;  %v620_v21 = vld [vmem:[#allocation6 + $0x50] sm:$0xff]  ;;  %vm158_vm2 = vcmask 254976   ;;  %vm165_vm3 = vcmask 517376   ;;  %vm280_vm4 = vcmask 74760  }
  0x11   :  { %v664_v7 = vld [vmem:[#allocation8] ss:$0 sm:$0xff]  ;;  %v665_v13 = vld [vmem:[#allocation8 + $0x1] ss:$0 sm:$0xff]  ;;  %214 = vmatpush.bf16.msra.mxu2 %v621_v18  ;;  %v619_v22 = vld [vmem:[#allocation6 + $0x48] sm:$0xff]  ;;  %s790_s30 = smov 127  }
  0x12   :  { %534 = vmatmul.msk.bf16.vlgmr.msra.gmra.mxu0 %vm75_vm0, %v62_v3  ;;  %v618_v23 = vld [vmem:[#allocation6 + $0x40] sm:$0xff]  ;;  %v625_v24 = vld [vmem:[#allocation6 + $0x78] sm:$0xff]  ;;  %v624_v25 = vld [vmem:[#allocation6 + $0x70] sm:$0xff]  ;;  %vm291_vm5 = vcmask 9216   ;;  %s791_s4 = smov 125   ;;  %v792_v49 = vmov 1  }
  0x13   :  { %270 = vmatpush.bf16.msra.mxu3 %v625_v24  ;;  %v623_v30 = vld [vmem:[#allocation6 + $0x68] sm:$0xff]  ;;  %v622_v31 = vld [vmem:[#allocation6 + $0x60] sm:$0xff]  ;;  %654 = vset.pattern.permute.xlu0 %v792_v49  ;;  %vm299_vm6 = vcmask 17408   ;;  %v793_v55 = vmov 2   ;;  %v794_v56 = vmov 3   ;;  %v795_v57 = vmov 5  }
  0x14   :  { %141 = vmatpush.bf16.msra.mxu1 %v616_v4  ;;  %v666_v32 = vld [vmem:[#allocation8 + $0x2] ss:$0 sm:$0xff]  ;;  %v667_v38 = vld [vmem:[#allocation8 + $0x3] ss:$0 sm:$0xff]  ;;  %657 = vset.pattern.permute.xlu1 %v794_v56  ;;  %v627_v60 = vld [vmem:[#allocation6 + $0x88] sm:$0xff]  ;;  %s796_s5 = smov 122  }
  0x15   :  { %215 = vmatpush.bf16.msra.mxu2 %v620_v21  ;;  %363 = vmatpush.bf16.msrb.mxu0 %v627_v60  ;;  %v626_v61 = vld [vmem:[#allocation6 + $0x80] sm:$0xff]  ;;  %vm353_vm7 = vcmask 261120   ;;  %vm307_vm8 = vcmask 25600   ;;  %v800_v24 = vmov 8   ;;  %s802_s6 = smov [#allocation9]   ;;  %s519_s10 = sshll.u32 %s873_s3, 4  ;;  %s520_s10 = int_to_ptr.hbm [resolvable:$true] %s519_s10 }
  0x16   :  { %659 = vset.pattern.permute.xlu2 %v800_v24  ;;  %s517_s7 = sshll.u32 %s802_s6, 4  ;;  %vm510_vm9 = vcmask 41984   ;;  %s518_s7 = int_to_ptr.vmem [resolvable:$true] %s517_s7 }
  0x17   :  { %271 = vmatpush.bf16.msra.mxu3 %v624_v25 }
  0x18   :  { %142 = vmatpush.bf16.msra.mxu1 %v615_v5 }
  0x19   :  { %216 = vmatpush.bf16.msra.mxu2 %v619_v22  ;;  %364 = vmatpush.bf16.msrb.mxu0 %v626_v61 }
  0x1b   :  { %272 = vmatpush.bf16.msra.mxu3 %v623_v30 }
  0x1c   :  { %143 = vmatpush.bf16.msra.mxu1 %v614_v6  ;;  %v797_v6 = vmov 4  }
  0x1d   :  { %217 = vmatpush.bf16.msra.mxu2 %v618_v23  ;;  %v799_v23 = vmov 7  }
  0x1f   :  { %273 = vmatpush.bf16.msra.mxu3 %v622_v31  ;;  %v628_v31 = vld [vmem:[#allocation6 + $0xa0] sm:$0xff] }
  0x8f   :  { %v88_v8 = vpop.f32.mrf.mxu0 }
  0x90   :  { %v89_v9 = vadd.f32 %v664_v7, %v88_v8 }
  0x92   :  { %v92_v10 = vmax.f32 %v89_v9, 0.0 }
  0x94   :  { %v93_v11 = vpack.c.bf16 %v92_v10, %v92_v10 }
  0x96   :  { %551 = vmatmul.msk.bf16.vlgmr.msra.gmra.mxu1 %vm132_vm1, %v93_v11  ;;  %v798_v11 = vmov 9  }
  0x97   :  { %v90_v12 = vpop.f32.mrf.mxu0 }
 0x113   :  { %v145_v14 = vpop.f32.mrf.mxu1 }
 0x114   :  { %v146_v15 = vadd.f32 %v665_v13, %v145_v14 }
 0x116   :  { %150 = vrot.lane.b32.xlu0 %v146_v15, %s788_s0  ;;  %v160_v16 = vmax.f32 %v146_v15, 0.0 }
 0x118   :  { %162 = vrot.lane.b32.xlu1 %v160_v16, %s788_s0 }
 0x11b   :  { %v147_v17 = vpop.f32.mrf.mxu1 }
 0x188   :  { %v151_v19 = vpop.permute.xlu0 %150 }
 0x189   :  { %v153_v20 = vmul.f32 %v151_v19, %v146_v15  ;;  %v668_v15 = vld [vmem:[#allocation8 + $0x4] ss:$0 sm:$0xff] }
 0x18a   :  { %v163_v27 = vpop.permute.xlu1 %162 }
 0x18b   :  { %155 = vrot.lane.b32.xlu0 %v153_v20, %s789_s2 }
 0x1fd   :  { %v156_v26 = vpop.permute.xlu0 %155 }
 0x1fe   :  { %159 = vst.msk [vmem:[#allocation2] sm:$0x3] %vm158_vm2, %v156_v26 }
 0x1ff   :  { %166 = vst.msk [vmem:[#allocation2] sm:$0x3] %vm165_vm3, %v163_v27 }
 0x206   :  { %v167_v28 = vld [vmem:[#allocation2] sm:$0x3] }
 0x207   :  { %v168_v29 = vpack.c.bf16 %v167_v28, %v167_v28  ;;  %v629_v28 = vld [vmem:[#allocation6 + $0xa8] sm:$0xff] }
 0x208   :  { %428 = vmatpush.bf16.msrb.mxu1 %v629_v28 }
 0x209   :  { %568 = vmatmul.msk.bf16.vlgmr.msra.gmra.mxu2 %vm132_vm1, %v168_v29 }
 0x20c   :  { %429 = vmatpush.bf16.msrb.mxu1 %v628_v31 }
 0x28c   :  { %v219_v33 = vpop.f32.mrf.mxu2 }
 0x28d   :  { %v220_v34 = vadd.f32 %v666_v32, %v219_v33  ;;  %v801_v33 = vmov 6  }
 0x28f   :  { %v837_v35 = vmax.f32 %v220_v34, 0.0 }
 0x291   :  { %v224_v36 = vpack.c.bf16 %v837_v35, %v837_v35 }
 0x293   :  { %585 = vmatmul.msk.bf16.vlgmr.msra.gmra.mxu3 %vm132_vm1, %v224_v36 }
 0x294   :  { %v221_v37 = vpop.f32.mrf.mxu2 }
 0x316   :  { %v275_v39 = vpop.f32.mrf.mxu3 }
 0x317   :  { %v276_v40 = vadd.f32 %v667_v38, %v275_v39  ;;  %v669_v38 = vld [vmem:[#allocation8 + $0x5] ss:$0 sm:$0xff] }
 0x319   :  { %v281_v41 = vsel %vm280_vm4, %v276_v40, -inf  ;;  %v847_v63 = vmax.f32 %v276_v40, 0.0 }
 0x31a   :  { %282 = vmax.xlane.f32.xlu1 %v281_v41 }
 0x31e   :  { %v277_v42 = vpop.f32.mrf.mxu3 }
 0x38d   :  { %v283_v43 = vpop.xlane.xlu1 %282 }
 0x38e   :  { %v284_v44 = vsub.f32 %v276_v40, %v283_v43 }
 0x390   :  { %v285_v45 = vmul.f32 1.442695, %v284_v44 }
 0x392   :  { %671 = vpow2.f32 %v285_v45  ;;  %v631_v45 = vld [vmem:[#allocation6 + $0xc8] sm:$0xff] }
 0x393   :  { %503 = vmatpush.bf16.msrb.mxu2 %v631_v45 }
 0x398   :  { %v842_v46 = vpop.eup %671 }
 0x399   :  { %288 = vrot.lane.b32.xlu2 %v842_v46, %s790_s30 }
 0x3f3   :  { %v289_v47 = vpop.permute.xlu2 %288 }
 0x3f4   :  { %v292_v48 = vsel %vm291_vm5, %v289_v47, 0.0 }
 0x3f5   :  { %293 = vadd.xlane.f32.xlu2 %v292_v48 }
 0x40d   :  { %296 = vrot.lane.b32.xlu2 %v842_v46, %s791_s4 }
 0x468   :  { %v294_v50 = vpop.xlane.xlu2 %293 }
 0x469   :  { %673 = vrcp.f32 %v294_v50 }
 0x46f   :  { %v674_v51 = vpop.eup %673 }
 0x470   :  { %v297_v52 = vpop.permute.xlu2 %296  ;;  %v312_v53 = vmul.f32 %v674_v51, %v842_v46 }
 0x471   :  { %v300_v54 = vsel %vm299_vm6, %v297_v52, 0.0 }
 0x472   :  { %317 = vperm.xlu0 %654, %v312_v53   ;;  %301 = vadd.xlane.f32.xlu1 %v300_v54 }
 0x47a   :  { %655 = vset.pattern.permute.xlu0 %v793_v55 }
 0x47b   :  { %322 = vperm.xlu0 %655, %v312_v53  }
 0x483   :  { %656 = vset.pattern.permute.xlu0 %v795_v57 }
 0x4e4   :  { %v318_v58 = vpop.permute.xlu0 %317 }
 0x4e5   :  { %v302_v59 = vpop.xlane.xlu1 %301  ;;  %v320_v2 = vmul.f32 %v318_v58, %v837_v35  ;;  %v670_v58 = vld [vmem:[#allocation8 + $0x6] ss:$0 sm:$0xff] }
 0x4e6   :  { %675 = vrcp.f32 %v302_v59 }
 0x4ec   :  { %v676_v62 = vpop.eup %675 }
 0x4ed   :  { %v323_v0 = vpop.permute.xlu0 %322  ;;  %v313_v1 = vmul.f32 %v676_v62, %v842_v46 }
 0x4ee   :  { %v325_v3 = vmul.f32 %v323_v0, %v847_v63 }
 0x4ef   :  { %373 = vperm.xlu1 %657, %v313_v1  }
 0x4f0   :  { %v326_v4 = vadd.f32 %v325_v3, %v320_v2 }
 0x4f2   :  { %v327_v5 = vpack.c.bf16 %v326_v4, %v326_v4 }
 0x4f4   :  { %339 = vrot.lane.b32.xlu0 %v327_v5, %s789_s2 }
 0x4f7   :  { %304 = vrot.lane.b32.xlu1 %v842_v46, %s796_s5 }
 0x4f8   :  { %660 = vset.pattern.permute.xlu1 %v798_v11 }
 0x4fc   :  { %384 = vperm.xlu0 %656, %v313_v1  }
 0x504   :  { %658 = vset.pattern.permute.xlu0 %v797_v6 }
 0x505   :  { %378 = vperm.xlu0 %658, %v313_v1  }
 0x50d   :  { %663 = vset.pattern.permute.xlu0 %v798_v11 }
 0x561   :  { %v374_v7 = vpop.permute.xlu1 %373 }
 0x562   :  { %v376_v26 = vmul.f32 %v374_v7, %v837_v35 }
 0x566   :  { %v340_v8 = vpop.permute.xlu0 %339 }
 0x567   :  { %594 = vmatmul.msk.bf16.vlgmr.msrb.gmra.mxu0 %vm353_vm7, %v340_v8 }
 0x569   :  { %v305_v9 = vpop.permute.xlu1 %304 }
 0x56a   :  { %v308_v10 = vsel %vm307_vm8, %v305_v9, 0.0 }
 0x56b   :  { %309 = vadd.xlane.f32.xlu0 %v308_v10 }
 0x56e   :  { %v385_v12 = vpop.permute.xlu0 %384 }
 0x577   :  { %v379_v13 = vpop.permute.xlu0 %378 }
 0x578   :  { %v381_v25 = vmul.f32 %v379_v13, %v847_v63 }
 0x57a   :  { %v382_v27 = vadd.f32 %v381_v25, %v376_v26 }
 0x5de   :  { %v310_v14 = vpop.xlane.xlu0 %309 }
 0x5df   :  { %677 = vrcp.f32 %v310_v14 }
 0x5e4   :  { %v366_v16 = vpop.f32.mrf.mxu0 }
 0x5e5   :  { %v678_v17 = vpop.eup %677  ;;  %v367_v18 = vadd.f32 %v668_v15, %v366_v16 }
 0x5e6   :  { %v314_v19 = vmul.f32 %v678_v17, %v842_v46  ;;  %v630_v46 = vld [vmem:[#allocation6 + $0xc0] sm:$0xff] }
 0x5e7   :  { %v370_v20 = vmax.f32 %v367_v18, 0.0  ;;  %504 = vmatpush.bf16.msrb.mxu2 %v630_v46 }
 0x5e8   :  { %459 = vperm.xlu1 %660, %v314_v19  }
 0x5e9   :  { %v387_v21 = vmul.f32 %v385_v12, %v370_v20 }
 0x5eb   :  { %389 = vrot.lane.b32.xlu2 %v387_v21, %s788_s0 }
 0x5ec   :  { %v368_v22 = vpop.f32.mrf.mxu0 }
 0x5f0   :  { %662 = vset.pattern.permute.xlu1 %v799_v23 }
 0x5f1   :  { %443 = vperm.xlu1 %662, %v314_v19  }
 0x645   :  { %v390_v29 = vpop.permute.xlu2 %389 }
 0x646   :  { %v392_v30 = vadd.f32 %v390_v29, %v382_v27 }
 0x648   :  { %v393_v32 = vpack.c.bf16 %v392_v30, %v392_v30 }
 0x64a   :  { %405 = vrot.lane.b32.xlu2 %v393_v32, %s789_s2 }
 0x652   :  { %449 = vperm.xlu2 %659, %v314_v19  }
 0x65a   :  { %661 = vset.pattern.permute.xlu2 %v801_v33  ;;  %v460_v42 = vpop.permute.xlu1 %459 }
 0x65b   :  { %438 = vperm.xlu2 %661, %v314_v19  }
 0x663   :  { %v444_v48 = vpop.permute.xlu1 %443 }
 0x664   :  { %v446_v50 = vmul.f32 %v444_v48, %v847_v63 }
 0x6a4   :  { %v406_v34 = vpop.permute.xlu2 %405 }
 0x6a5   :  { %603 = vmatmul.msk.bf16.vlgmr.msrb.gmra.mxu1 %vm353_vm7, %v406_v34 }
 0x6ac   :  { %v450_v36 = vpop.permute.xlu2 %449 }
 0x6ad   :  { %v452_v37 = vmul.f32 %v450_v36, %v370_v20 }
 0x6af   :  { %454 = vrot.lane.b32.xlu2 %v452_v37, %s788_s0 }
 0x6b5   :  { %v439_v47 = vpop.permute.xlu2 %438 }
 0x6b6   :  { %v441_v49 = vmul.f32 %v439_v47, %v837_v35 }
 0x6b8   :  { %v447_v52 = vadd.f32 %v446_v50, %v441_v49 }
 0x709   :  { %v455_v51 = vpop.permute.xlu2 %454 }
 0x70a   :  { %v457_v53 = vadd.f32 %v455_v51, %v447_v52 }
 0x722   :  { %v431_v39 = vpop.f32.mrf.mxu1 }
 0x723   :  { %v432_v40 = vadd.f32 %v669_v38, %v431_v39 }
 0x725   :  { %v435_v41 = vmax.f32 %v432_v40, 0.0 }
 0x727   :  { %v462_v43 = vmul.f32 %v460_v42, %v435_v41 }
 0x729   :  { %464 = vrot.lane.b32.xlu1 %v462_v43, %s788_s0 }
 0x72a   :  { %v433_v44 = vpop.f32.mrf.mxu1 }
 0x79b   :  { %v465_v54 = vpop.permute.xlu1 %464 }
 0x79c   :  { %v467_v55 = vadd.f32 %v465_v54, %v457_v53 }
 0x79e   :  { %v468_v56 = vpack.c.bf16 %v467_v55, %v467_v55 }
 0x7a0   :  { %480 = vrot.lane.b32.xlu2 %v468_v56, %s789_s2 }
 0x7fa   :  { %v481_v57 = vpop.permute.xlu2 %480 }
 0x7fb   :  { %612 = vmatmul.msk.bf16.vlgmr.msrb.gmra.mxu2 %vm353_vm7, %v481_v57 }
 0x87e   :  { %v506_v35 = vpop.f32.mrf.mxu2 }
 0x87f   :  { %v507_v59 = vadd.f32 %v670_v58, %v506_v35 }
 0x881   :  { %511 = vst.msk [vmem:[#allocation9] sm:$0x3] %vm510_vm9, %v507_v59 }
 0x882   :  { %522 = dma.vmem_to_hbm [thread:$0]  %s518_s7, 32, %s520_s10, [#allocation5]  }
 0x886   :  { %v508_v60 = vpop.f32.mrf.mxu2 }
 0x887   :  { %779 = dma.done.wait [#allocation5], 32  }
 0x888   :  { %780 = vsyncadd [#allocation5], 4294967264 }
 0x889   :  { %527 = vsyncpa [#allocation4], 1 }
 0x88a   :  { %528 = vsyncpa [#allocation7], 1 }
 0x88b   :  { %529 = vsyncpa [#allocation5], 1 }

</bundles_post_ra>
